<compile_context>
chip_gen: v6e
topology: v6e:2x2x1
jax: 0.10.0
libtpu: 0.0.40
codegen_flags: <defaults>
</compile_context>

<pallas_src>
import math
from functools import partial

import jax
import jax.numpy as jnp
from jax.experimental import pallas as pl
from jax.experimental.pallas import tpu as pltpu


def find_multiple(n: int, k: int) -> int:
    if n % k == 0:
        return n
    return n + k - n % k


def ffn_kernel(x_ref, w13_ref, w2_ref, o_ref, acc_ref, *, th):
    """Grid step (i, j): accumulate one hidden-chunk of the SwiGLU FFN for
    M-tile i: acc += (silu(x @ w1_j) * (x @ w3_j)) @ w2_j."""
    j = pl.program_id(1)

    @pl.when(j == 0)
    def _():
        acc_ref[...] = jnp.zeros_like(acc_ref)

    x = x_ref[...]                                                     # (tm, D)
    # Fused gate/up projection: one MXU matmul covers both w1 and w3 chunks.
    h = jnp.dot(x, w13_ref[...], preferred_element_type=jnp.float32)   # (tm, 2*th)
    h1 = h[:, :th]
    h3 = h[:, th:]
    gated = h1 * jax.nn.sigmoid(h1) * h3                               # f32 gating
    acc_ref[...] += jnp.dot(gated.astype(w2_ref.dtype), w2_ref[...],
                            preferred_element_type=jnp.float32)        # (tm, D)

    @pl.when(j == pl.num_programs(1) - 1)
    def _():
        o_ref[...] = acc_ref[...].astype(o_ref.dtype)


def feed_forward(x, w1, w3, w2, *, tm=256, th=256,
                 compute_dtype=jnp.bfloat16):
    """x: (B, S, D); w1/w3: (D, H); w2: (H, D). Returns (B, S, D) in x.dtype."""
    B, S, D = x.shape
    H = w1.shape[1]
    M = B * S
    out_dtype = x.dtype

    # --- tile sizing + padding (keeps (8,128) alignment without hard asserts)
    tm = min(tm, find_multiple(M, 8))
    th = min(th, find_multiple(H, 128))
    M_pad = find_multiple(M, tm)
    H_pad = find_multiple(H, th)

    x2d = x.reshape(M, D).astype(compute_dtype)
    if M_pad != M:
        x2d = jnp.pad(x2d, ((0, M_pad - M), (0, 0)))

    w1c = w1.astype(compute_dtype)
    w3c = w3.astype(compute_dtype)
    w2c = w2.astype(compute_dtype)
    if H_pad != H:
        # Zero-padding the hidden dim is exact: silu(0)*0 = 0, and the padded
        # w2 rows are zero, so padded hidden units contribute nothing.
        w1c = jnp.pad(w1c, ((0, 0), (0, H_pad - H)))
        w3c = jnp.pad(w3c, ((0, 0), (0, H_pad - H)))
        w2c = jnp.pad(w2c, ((0, H_pad - H), (0, 0)))

    n_h = H_pad // th
    n_m = M_pad // tm

    # Interleave per hidden chunk so block j of shape (D, 2*th) holds
    # [w1_chunk_j | w3_chunk_j] contiguously.
    w13 = jnp.concatenate(
        [w1c.reshape(D, n_h, th), w3c.reshape(D, n_h, th)], axis=2
    ).reshape(D, 2 * H_pad)

    itemsize = jnp.dtype(compute_dtype).itemsize
    out_itemsize = jnp.dtype(out_dtype).itemsize
    vmem_est = (2 * tm * D * itemsize            # x tile (double-buffered)
                + 2 * D * 2 * th * itemsize      # fused w13 tile
                + 2 * th * D * itemsize          # w2 tile
                + 2 * tm * D * out_itemsize      # output tile
                + tm * D * 4)                    # f32 accumulator scratch
    vmem_limit = min(max(int(vmem_est * 1.5), 16 * 1024 * 1024),
                     48 * 1024 * 1024)

    cost = pl.CostEstimate(
        flops=6 * M_pad * D * H_pad,
        transcendentals=M_pad * H_pad,
        bytes_accessed=(x2d.size * itemsize
                        + n_m * (w13.size + w2c.size) * itemsize
                        + M_pad * D * out_itemsize),
    )

    out2d = pl.pallas_call(
        partial(ffn_kernel, th=th),
        out_shape=jax.ShapeDtypeStruct((M_pad, D), out_dtype),
        grid_spec=pltpu.PrefetchScalarGridSpec(
            num_scalar_prefetch=0,
            grid=(n_m, n_h),                                     # H axis = reduction (last)
            in_specs=[
                pl.BlockSpec((tm, D), lambda i, j: (i, 0)),      # x rows tile
                pl.BlockSpec((D, 2 * th), lambda i, j: (0, j)),  # fused [w1|w3] chunk
                pl.BlockSpec((th, D), lambda i, j: (j, 0)),      # w2 chunk
            ],
            out_specs=pl.BlockSpec((tm, D), lambda i, j: (i, 0)),
            scratch_shapes=[pltpu.VMEM((tm, D), jnp.float32)],   # accumulator
        ),
        compiler_params=pltpu.CompilerParams(
            dimension_semantics=("parallel", "arbitrary"),
            vmem_limit_bytes=vmem_limit,
        ),
        cost_estimate=cost,
    )(x2d, w13, w2c)

    if M_pad != M:
        out2d = out2d[:M]
    return out2d.reshape(B, S, D)


def reference_ffn(x, w1, w3, w2):
    h1 = x @ w1
    h3 = x @ w3
    return (jax.nn.silu(h1) * h3) @ w2


if __name__ == "__main__":
    # Small ModelArgs-consistent config: dim=128, multiple_of=256,
    # ffn_dim_multiplier=None  ->  hidden = find_multiple(int(2*4*128/3), 256) = 512
    dim = 128
    multiple_of = 256
    hidden_dim = 4 * dim
    hidden_dim = int(2 * hidden_dim / 3)
    hidden_dim = find_multiple(hidden_dim, multiple_of)  # 512

    B, S = 2, 8

    key = jax.random.PRNGKey(0)
    kx, k1, k2, k3 = jax.random.split(key, 4)

    x = jax.random.normal(kx, (B, S, dim), dtype=jnp.float32)
    # nn.Linear weight shapes: w1/w3: (hidden, dim), w2: (dim, hidden).
    # Transpose to (in, out) for the kernel.
    lim1 = 1.0 / math.sqrt(dim)
    lim2 = 1.0 / math.sqrt(hidden_dim)
    w1_t = jax.random.uniform(k1, (hidden_dim, dim), jnp.float32, -lim1, lim1).T
    w3_t = jax.random.uniform(k3, (hidden_dim, dim), jnp.float32, -lim1, lim1).T
    w2_t = jax.random.uniform(k2, (dim, hidden_dim), jnp.float32, -lim2, lim2).T

    out = feed_forward(x, w1_t, w3_t, w2_t, tm=256, th=256)
    out = jax.block_until_ready(out)

    # Reference computed in f32 from the same bf16-quantized operands the
    # kernel consumes (kernel accumulates in f32 via preferred_element_type).
    xb = x.astype(jnp.bfloat16).astype(jnp.float32)
    w1b = w1_t.astype(jnp.bfloat16).astype(jnp.float32)
    w3b = w3_t.astype(jnp.bfloat16).astype(jnp.float32)
    w2b = w2_t.astype(jnp.bfloat16).astype(jnp.float32)
    ref = reference_ffn(xb, w1b, w3b, w2b)

    assert out.shape == (B, S, dim)
    err = float(jnp.max(jnp.abs(out.astype(jnp.float32) - ref)))
    assert err < 2e-2, f"mismatch vs reference: max abs err {err}"

    # Exercise the padded-M path (B*S not a multiple of the row tile).
    x_odd = jax.random.normal(kx, (2, 7, dim), dtype=jnp.float32)
    out_odd = jax.block_until_ready(
        feed_forward(x_odd, w1_t, w3_t, w2_t, tm=256, th=256))
    ref_odd = reference_ffn(x_odd.astype(jnp.bfloat16).astype(jnp.float32),
                            w1b, w3b, w2b)
    assert out_odd.shape == (2, 7, dim)
    err_odd = float(jnp.max(jnp.abs(out_odd.astype(jnp.float32) - ref_odd)))
    assert err_odd < 2e-2, f"padded-M mismatch: max abs err {err_odd}"

    print("KERNEL_OK")
</pallas_src>

<mosaic_0001>
module attributes {stable_mosaic.version = 11 : i64} {
  func.func @ffn_kernel(%arg0: i32, %arg1: i32, %arg2: memref<16x128xbf16, #tpu.memory_space<vmem>>, %arg3: memref<128x512xbf16, #tpu.memory_space<vmem>>, %arg4: memref<256x128xbf16, #tpu.memory_space<vmem>>, %arg5: memref<16x128xf32, #tpu.memory_space<vmem>>, %arg6: memref<16x128xf32, #tpu.memory_space<vmem>>) attributes {dimension_semantics = [#tpu.dimension_semantics<parallel>, #tpu.dimension_semantics<arbitrary>], iteration_bounds = array<i64: 1, 2>, scalar_prefetch = 0 : i64, scratch_operands = 1 : i64, tpu.core_type = #tpu.core_type<tc>, window_params = [{transform_indices = @transform_0, window_bounds = array<i64: 16, 128>}, {transform_indices = @transform_1, window_bounds = array<i64: 128, 512>}, {transform_indices = @transform_2, window_bounds = array<i64: 256, 128>}, {transform_indices = @transform_3, window_bounds = array<i64: 16, 128>}]} {
    %c0_i32 = arith.constant 0 : i32
    %0 = arith.cmpi eq, %arg1, %c0_i32 : i32
    %1 = arith.extui %0 : i1 to i32
    %c0_i32_0 = arith.constant 0 : i32
    %2 = arith.cmpi ne, %1, %c0_i32_0 : i32
    scf.if %2 {
      %cst_13 = arith.constant 0.000000e+00 : f32
      %24 = vector.broadcast %cst_13 : f32 to vector<16x128xf32>
      %c0_14 = arith.constant 0 : index
      %c0_15 = arith.constant 0 : index
      %25 = vector.load %arg6[%c0_14, %c0_15] : memref<16x128xf32, #tpu.memory_space<vmem>>, vector<16x128xf32>
      tpu.vector_store %arg6[%c0_14, %c0_15], %24 {strides = array<i32>} : memref<16x128xf32, #tpu.memory_space<vmem>>, vector<16x128xf32>,
    } else {
    }
    %c0 = arith.constant 0 : index
    %c0_1 = arith.constant 0 : index
    %3 = vector.load %arg2[%c0, %c0_1] : memref<16x128xbf16, #tpu.memory_space<vmem>>, vector<16x128xbf16>
    %c0_2 = arith.constant 0 : index
    %c0_3 = arith.constant 0 : index
    %4 = vector.load %arg3[%c0_2, %c0_3] : memref<128x512xbf16, #tpu.memory_space<vmem>>, vector<128x512xbf16>
    %cst = arith.constant dense<0.000000e+00> : vector<16x512xf32>
    %5 = tpu.matmul %3, %4, %cst {dimension_numbers = #tpu.dot_dimension_numbers<[1], [0], [0], [1], [0, 0, 1, 1], [], []>} : vector<16x128xbf16>, vector<128x512xbf16>, vector<16x512xf32> -> vector<16x512xf32>
    %6 = vector.extract_strided_slice %5 {offsets = [0, 0], sizes = [16, 256], strides = [1, 1]} : vector<16x512xf32> to vector<16x256xf32>
    %7 = vector.extract_strided_slice %5 {offsets = [0, 256], sizes = [16, 256], strides = [1, 1]} : vector<16x512xf32> to vector<16x256xf32>
    %8 = arith.negf %6 : vector<16x256xf32>
    %9 = math.exp %8 : vector<16x256xf32>
    %cst_4 = arith.constant 1.000000e+00 : f32
    %10 = vector.broadcast %cst_4 : f32 to vector<16x256xf32>
    %11 = arith.addf %10, %9 : vector<16x256xf32>
    %12 = arith.divf %10, %11 : vector<16x256xf32>
    %13 = arith.mulf %6, %12 : vector<16x256xf32>
    %14 = arith.mulf %13, %7 : vector<16x256xf32>
    %c0_5 = arith.constant 0 : index
    %c0_6 = arith.constant 0 : index
    %15 = vector.load %arg6[%c0_5, %c0_6] : memref<16x128xf32, #tpu.memory_space<vmem>>, vector<16x128xf32>
    %16 = arith.truncf %14 : vector<16x256xf32> to vector<16x256xbf16>
    %c0_7 = arith.constant 0 : index
    %c0_8 = arith.constant 0 : index
    %17 = vector.load %arg4[%c0_7, %c0_8] : memref<256x128xbf16, #tpu.memory_space<vmem>>, vector<256x128xbf16>
    %cst_9 = arith.constant dense<0.000000e+00> : vector<16x128xf32>
    %18 = tpu.matmul %16, %17, %cst_9 {dimension_numbers = #tpu.dot_dimension_numbers<[1], [0], [0], [1], [0, 0, 1, 1], [], []>} : vector<16x256xbf16>, vector<256x128xbf16>, vector<16x128xf32> -> vector<16x128xf32>
    %19 = arith.addf %15, %18 : vector<16x128xf32>
    %c0_10 = arith.constant 0 : index
    %c0_11 = arith.constant 0 : index
    %20 = vector.load %arg6[%c0_10, %c0_11] : memref<16x128xf32, #tpu.memory_space<vmem>>, vector<16x128xf32>
    tpu.vector_store %arg6[%c0_10, %c0_11], %19 {strides = array<i32>} : memref<16x128xf32, #tpu.memory_space<vmem>>, vector<16x128xf32>,
    %c1_i32 = arith.constant 1 : i32
    %21 = arith.cmpi eq, %arg1, %c1_i32 : i32
    %22 = arith.extui %21 : i1 to i32
    %c0_i32_12 = arith.constant 0 : i32
    %23 = arith.cmpi ne, %22, %c0_i32_12 : i32
    scf.if %23 {
      %c0_13 = arith.constant 0 : index
      %c0_14 = arith.constant 0 : index
      %24 = vector.load %arg6[%c0_13, %c0_14] : memref<16x128xf32, #tpu.memory_space<vmem>>, vector<16x128xf32>
      %c0_15 = arith.constant 0 : index
      %c0_16 = arith.constant 0 : index
      %25 = vector.load %arg5[%c0_15, %c0_16] : memref<16x128xf32, #tpu.memory_space<vmem>>, vector<16x128xf32>
      tpu.vector_store %arg5[%c0_15, %c0_16], %24 {strides = array<i32>} : memref<16x128xf32, #tpu.memory_space<vmem>>, vector<16x128xf32>,
    } else {
    }
    return
  }
  func.func @transform_0(%arg0: i32, %arg1: i32) -> (i32, i32) {
    %c0_i32 = arith.constant 0 : i32
    %c0_i32_0 = arith.constant 0 : i32
    return %arg0, %c0_i32 : i32, i32
  }
  func.func @transform_1(%arg0: i32, %arg1: i32) -> (i32, i32) {
    %c0_i32 = arith.constant 0 : i32
    %c0_i32_0 = arith.constant 0 : i32
    return %c0_i32, %arg1 : i32, i32
  }
  func.func @transform_2(%arg0: i32, %arg1: i32) -> (i32, i32) {
    %c0_i32 = arith.constant 0 : i32
    %c0_i32_0 = arith.constant 0 : i32
    return %arg1, %c0_i32 : i32, i32
  }
  func.func @transform_3(%arg0: i32, %arg1: i32) -> (i32, i32) {
    %c0_i32 = arith.constant 0 : i32
    %c0_i32_0 = arith.constant 0 : i32
    return %arg0, %c0_i32 : i32, i32
  }
}

</mosaic_0001>

<bundles_post_ra>
// kernel: tpu_custom_call.1
= control target key start
LH: loop header
LB: loop body
LE: loop exit
PB: predicated region body
PF: predicated region fallthrough
CT: control target
= control target key end

     0   :  { %8 = vsyncpa [#allocation4], 0  ;;  %s1554_s0 = inlined_call_operand.hbm [shape: bf16[16,128], index: 0, kind: input, shape index: {}]   ;;  %s1555_s1 = inlined_call_operand.hbm [shape: bf16[128,1024], index: 1, kind: input, shape index: {}]   ;;  %s1556_s2 = inlined_call_operand.hbm [shape: bf16[512,128], index: 2, kind: input, shape index: {}]   ;;  %s1557_s3 = inlined_call_operand.hbm [shape: f32[16,128], index: 3, kind: output, shape index: {}]  }
   0x1   :  { %9 = vsyncpa [#allocation7], 0 }
   0x2   :  { %11 = vsyncpa [#allocation7 + $0x1], 0 }
   0x3   :  { %12 = vsyncpa [#allocation5], 0  ;;  %s1339_s12 = smov 0   ;;  %s1341_s13 = smov 0  }
   0x4   :  { %s1343_s14 = smov 0   ;;  %s1345_s15 = smov 0  }
   0x5   :  { %s1347_s16 = smov 0   ;;  %s1349_s17 = smov 0  }
   0x6 LB: > { %s27_s18 = sadd.s32 1, %s1300_s16  ;;  %s63_s19 = sadd.s32 1, %s1292_s14  ;;  %s1304_s17 = sphi %s1349_s17, %s18_s17   ;;  %s1300_s16 = sphi %s1347_s16, %s1566_s16   ;;  %s1296_s15 = sphi %s1345_s15, %s1565_s15   ;;  %s1292_s14 = sphi %s1343_s14, %s1564_s14   ;;  %s1288_s13 = sphi %s1341_s13, %s1563_s13   ;;  %s1284_s12 = sphi %s1339_s12, %s1562_s12  }
   0x7   : > { %p28_p0 = scmp.ge.s32.totalorder %s27_s18, 2  ;;  %p70_p1 = scmp.ne.s32.totalorder %s1292_s14, %s1288_s13 }
   0x8   : > { %p71_p2 = scmp.eq.s32.totalorder %s1304_s17, 0  ;;  %p996_p4 = scmp.lt.s32.totalorder %s1304_s17, 2 }
   0x9   : > { %s1568_s18 = smov (%p28_p0, %s27_s18), 0  ;;  %s168_s21 = sand.u32 1, %s1304_s17  }
   0xa   : > { %p72_p3 = por %p71_p2, %p70_p1  ;;  %s60_s20 = ssub.s32 %s1300_s16, %s1568_s18 }
   0xb   : > { %p61_p5 = scmp.eq.s32.totalorder %s60_s20, 0  ;;  %s170_s22 = sand.u32 1, %s1292_s14  }
   0xc   : > { %s948_s23 = sshll.u32 %s1300_s16, 8  ;;  %s879_s25 = sshll.u32 %s170_s22, 8 }
   0xd   : > { %s1383_s24 = scalar_select %p61_p5, %s1292_s14, %s63_s19  }
   0xe   : > { %s178_s28 = scalar_lea.hbm %s1555_s1, %s948_s23  ;;  %p1390_p6 = pnand %p996_p4, %p72_p3 }
   0xf   : > { %s172_s30 = scalar_lea.vmem [#allocation6], %s879_s25  ;;  %s1394_s5 = scalar_lea.sflag [#allocation7], %s168_s21 }
  0x10   : > { %s179_s4 = sshll.u32 %s172_s30, 4  ;;  %p1142_p7 = pneg %p1390_p6  ;;  %s180_s4 = int_to_ptr.vmem [resolvable:$true] %s179_s4 }
  0x11   : > { %s1153_s6 = scalar_lea.vmem %s180_s4, 4096  ;;  %s1306_s7 = smov [#allocation6]  }
  0x12   : > { %p1154_p8 = scmp.ne.s32.totalorder %s180_s4, %s1153_s6  ;;  %s1158_s8 = sshll.u32 %s1306_s7, 4  ;;  %s1159_s8 = int_to_ptr.vmem [resolvable:$false] %s1158_s8 }
  0x13   : > { %s1160_s9 = scalar_lea.vmem %s1159_s8, 8192  ;;  %p1161_p11 = scmp.lt.s32.totalorder %s180_s4, %s1159_s8 }
  0x14   : > { %p1156_p9 = pnand %p1154_p8, %p1142_p7  ;;  %p1162_p12 = scmp.lt.s32.totalorder %s1160_s9, %s1153_s6 }
  0x16   : > { %p1157_p10 = pneg %p1156_p9  ;;  %p1163_p13 = por %p1162_p12, %p1161_p11 }
  0x18   : > { %p1164_p0 = pnand %p1163_p13, %p1157_p10 }
  0x1a   : > { %1167 = shalt.err (!%p1164_p0)
}
  0x1b   : > { %s1307_s10 = smov 512   ;;  %s1308_s11 = smov 256  }
  0x1c   : > { %s1309_s19 = smov 16   ;;  %s1405_s20 = sadd.s32 4294967295, %s1304_s17  }
  0x1d   : > { %991 = dma.hbm_to_vmem [thread:$0]  (!%p1390_p6), %s178_s28, 4096, %s180_s4, %s1394_s5, %s1307_s10, %s1308_s11, %s1309_s19  }
  0x1e   : > { %p76_p1 = scmp.ne.s32.totalorder %s1288_s13, %s1284_s12  ;;  %p77_p2 = scmp.eq.s32.totalorder %s1405_s20, 0 }
  0x1f   : > { %p876_p3 = scmp.ge.s32.totalorder %s1304_s17, 1  ;;  %p139_p4 = scmp.lt.s32.totalorder %s1304_s17, 3 }
  0x20   : > { %p1414_p5 = por %p77_p2, %p76_p1  ;;  %s1310_s25 = smov [#allocation3]  }
  0x21   : > { %p1418_p8 = pnand %p876_p3, %p139_p4  ;;  %s154_s26 = sshll.u32 %s1310_s25, 4  ;;  %s155_s26 = int_to_ptr.vmem [resolvable:$true] %s154_s26 }
  0x22   : > { %s882_s12 = sshll.u32 %s170_s22, 7  ;;  %s949_s27 = sshll.u32 %s1300_s16, 11 }
  0x23   : > { %p984_p9 = pneg %p1418_p8  ;;  %s1436_s6 = scalar_lea.hbm %s1556_s2, %s949_s27 }
  0x24   : > { %s193_s7 = scalar_lea.vmem [#allocation8], %s882_s12  ;;  %s1179_s9 = scalar_lea.vmem %s155_s26, 128 }
  0x25   : > { %p1429_p10 = pnand %p984_p9, %p77_p2  ;;  %s200_s8 = sshll.u32 %s193_s7, 4  ;;  %s1438_s8 = int_to_ptr.vmem [resolvable:$true] %s200_s8 }
  0x26   : > { %p1180_p12 = scmp.ne.s32.totalorder %s155_s26, %s1179_s9  ;;  %p1187_p1 = scmp.lt.s32.totalorder %s155_s26, %s155_s26 }
  0x27   : > { %p1170_p11 = pneg %p1429_p10  ;;  %p1188_p3 = scmp.lt.s32.totalorder %s1179_s9, %s1179_s9 }
  0x29   : > { %p1182_p13 = pnand %p1180_p12, %p1170_p11  ;;  %p1189_p4 = por %p1188_p3, %p1187_p1 }
  0x2b   : > { %p1183_p0 = pneg %p1182_p13 }
  0x2d   : > { %p1190_p9 = pnand %p1189_p4, %p1183_p0 }
  0x2f   : > { %1193 = shalt.err (!%p1190_p9)
}
  0x30   : > { %s1311_s22 = smov 64   ;;  %s1312_s10 = smov 4  }
  0x31   : > { %987 = dma.hbm_to_vmem [thread:$0]  (!%p1429_p10), %s1554_s0, 128, %s155_s26, [#allocation4], %s1311_s22, %s1311_s22, %s1312_s10  }
  0x32   : > { %s1207_s25 = scalar_lea.vmem %s1438_s8, 2048  ;;  %s1313_s12 = smov [#allocation8]  }
  0x33   : > { %p1208_p11 = scmp.ne.s32.totalorder %s1438_s8, %s1207_s25  ;;  %s1212_s27 = sshll.u32 %s1313_s12, 4  ;;  %s1213_s27 = int_to_ptr.vmem [resolvable:$false] %s1212_s27 }
  0x34   : > { %s1214_s30 = scalar_lea.vmem %s1213_s27, 4096  ;;  %p1215_p0 = scmp.lt.s32.totalorder %s1438_s8, %s1213_s27 }
  0x35   : > { %p1210_p12 = pnand %p1208_p11, %p1142_p7  ;;  %p1216_p1 = scmp.lt.s32.totalorder %s1214_s30, %s1207_s25 }
  0x37   : > { %p1211_p13 = pneg %p1210_p12  ;;  %p1217_p3 = por %p1216_p1, %p1215_p0 }
  0x39   : > { %p1218_p4 = pnand %p1217_p3, %p1211_p13 }
  0x3b   : > { %1221 = shalt.err (!%p1218_p4)
}
  0x3c   : > { %994 = dma.hbm_to_vmem [thread:$0]  (!%p1390_p6), %s1436_s6, 2048, %s1438_s8, %s1394_s5, %s1311_s22, %s1311_s22, %s1312_s10  }
  0x3d   : > { %212 = sbr.rel (%p1418_p8) target bundleno = 580 (0x244), region = 32 }
  0x42   : > { %1271 = dma.done.wait (%p77_p2), [#allocation4], 128  }
  0x43   : > { %1273 = vsyncadd (%p77_p2), [#allocation4], 4294967168  ;;  %s218_s26 = sand.u32 1, %s1405_s20   ;;  %s220_s28 = sand.u32 1, %s1288_s13  }
  0x44   : > { %s887_s4 = sshll.u32 %s220_s28, 8  ;;  %s219_s29 = scalar_lea.sflag [#allocation7], %s218_s26 }
  0x45   : > { %s1466_s7 = scalar_lea.vmem [#allocation6], %s887_s4 }
  0x46   : > { %1275 = dma.done.wait (%p1414_p5), %s219_s29, 6144  }
  0x47   : > { %1277 = vsyncadd (%p1414_p5), %s219_s29, 4294961152  ;;  %s888_s5 = sshll.u32 %s220_s28, 7  ;;  %p889_p6 = scmp.ne.s32.totalorder %s1296_s15, 0 }
  0x48   : > { %s1472_s23 = scalar_lea.vmem [#allocation8], %s888_s5 }
  0x49   : > { %262 = sbr.rel (%p889_p6) target bundleno = 80 (0x50), region = 48 }
  0x4e   : > { %v1314_v0 = vmov 0.0  }
  0x4f   : > { %263 = vst [vmem:[#allocation2] sm:$0xff] %v1314_v0  ;;  %264 = vst [vmem:[#allocation2 + $0x8] sm:$0xff] %v1314_v0 }
  0x50 PF: > { %v1059_v1 = vld [vmem:[%s1466_s7 + $0xe4] ss:$16 sps:$4 sm:$0xff]   ;;  %v1061_v2 = vld [vmem:[%s1466_s7 + $0xe0] ss:$16 sps:$4 sm:$0xff]   ;;  %v1315_v3 = vmov 0   ;;  %v1086_v29 = vld [vmem:[#allocation3] sm:$0xff]  }
  0x51   : > { %497 = vmatprep.mubr.bf16.mxu0 %v1315_v3  ;;  %540 = vmatprep.mubr.bf16.mxu1 %v1315_v3  ;;  %v1062_v4 = vld [vmem:[%s1466_s7 + $0xc4] ss:$16 sps:$4 sm:$0xff]   ;;  %v1064_v5 = vld [vmem:[%s1466_s7 + $0xc0] ss:$16 sps:$4 sm:$0xff]   ;;  %v1082_v10 = vld [vmem:[%s1466_s7 + $0xec] ss:$16 sps:$4 sm:$0xff]  }
  0x52   : > { %465 = vmatprep.subr.bf16.mxu0 %v1059_v1  ;;  %v1065_v6 = vld [vmem:[%s1466_s7 + $0xa4] ss:$16 sps:$4 sm:$0xff]   ;;  %v1067_v7 = vld [vmem:[%s1466_s7 + $0xa0] ss:$16 sps:$4 sm:$0xff]   ;;  %v1085_v11 = vld [vmem:[%s1466_s7 + $0xe8] ss:$16 sps:$4 sm:$0xff]   ;;  %508 = vmatprep.subr.bf16.mxu1 %v1082_v10 }
  0x53   : > { %466 = vmatpush1.bf16.msra.mxu0 %v1061_v2  ;;  %v1068_v8 = vld [vmem:[%s1466_s7 + $0x84] ss:$16 sps:$4 sm:$0xff]   ;;  %v1070_v9 = vld [vmem:[%s1466_s7 + $0x80] ss:$16 sps:$4 sm:$0xff]   ;;  %v1087_v13 = vld [vmem:[%s1466_s7 + $0xcc] ss:$16 sps:$4 sm:$0xff]   ;;  %509 = vmatpush1.bf16.msra.mxu1 %v1085_v11 }
  0x54   : > { %467 = vmatprep.subr.bf16.mxu0 %v1062_v4  ;;  %v1071_v12 = vld [vmem:[%s1466_s7 + $0x64] ss:$16 sps:$4 sm:$0xff]   ;;  %v1089_v14 = vld [vmem:[%s1466_s7 + $0xc8] ss:$16 sps:$4 sm:$0xff]   ;;  %v1073_v15 = vld [vmem:[%s1466_s7 + $0x60] ss:$16 sps:$4 sm:$0xff]   ;;  %510 = vmatprep.subr.bf16.mxu1 %v1087_v13 }
  0x55   : > { %v1090_v16 = vld [vmem:[%s1466_s7 + $0xac] ss:$16 sps:$4 sm:$0xff]   ;;  %v1074_v17 = vld [vmem:[%s1466_s7 + $0x44] ss:$16 sps:$4 sm:$0xff]   ;;  %v1092_v18 = vld [vmem:[%s1466_s7 + $0xa8] ss:$16 sps:$4 sm:$0xff]  }
  0x56   : > { %v1076_v19 = vld [vmem:[%s1466_s7 + $0x40] ss:$16 sps:$4 sm:$0xff]   ;;  %v1093_v20 = vld [vmem:[%s1466_s7 + $0x8c] ss:$16 sps:$4 sm:$0xff]   ;;  %v1077_v21 = vld [vmem:[%s1466_s7 + $0x24] ss:$16 sps:$4 sm:$0xff]  }
  0x57   : > { %468 = vmatpush1.bf16.msra.mxu0 %v1064_v5  ;;  %511 = vmatpush1.bf16.msra.mxu1 %v1089_v14  ;;  %v1079_v22 = vld [vmem:[%s1466_s7 + $0x20] ss:$16 sps:$4 sm:$0xff]   ;;  %v1095_v23 = vld [vmem:[%s1466_s7 + $0x88] ss:$16 sps:$4 sm:$0xff]   ;;  %v1080_v24 = vld [vmem:[%s1466_s7 + $0x4] ss:$16 sps:$4 sm:$0xff]  }
  0x58   : > { %469 = vmatprep.subr.bf16.mxu0 %v1065_v6  ;;  %512 = vmatprep.subr.bf16.mxu1 %v1090_v16  ;;  %v1096_v25 = vld [vmem:[%s1466_s7 + $0x6c] ss:$16 sps:$4 sm:$0xff]   ;;  %v1098_v26 = vld [vmem:[%s1466_s7 + $0x68] ss:$16 sps:$4 sm:$0xff]   ;;  %v1084_v27 = vld [vmem:[%s1466_s7] ss:$16 sps:$4 sm:$0xff]  }
  0x59   : > { %v1099_v28 = vld [vmem:[%s1466_s7 + $0x4c] ss:$16 sps:$4 sm:$0xff]   ;;  %v1101_v30 = vld [vmem:[%s1466_s7 + $0x48] ss:$16 sps:$4 sm:$0xff]   ;;  %v1110_v37 = vld [vmem:[%s1472_s23 + $0x70] sm:$0xff]   ;;  %p943_p7 = scmp.ne.s32.totalorder %s1296_s15, 1 }
  0x5a   : > { %v1102_v31 = vld [vmem:[%s1466_s7 + $0x2c] ss:$16 sps:$4 sm:$0xff]   ;;  %v1104_v32 = vld [vmem:[%s1466_s7 + $0x28] ss:$16 sps:$4 sm:$0xff]   ;;  %v1111_v38 = vld [vmem:[%s1472_s23 + $0x30] sm:$0xff]  }
  0x5b   : > { %470 = vmatpush1.bf16.msra.mxu0 %v1067_v7  ;;  %513 = vmatpush1.bf16.msra.mxu1 %v1092_v18  ;;  %v1105_v33 = vld [vmem:[%s1466_s7 + $0xc] ss:$16 sps:$4 sm:$0xff]   ;;  %v1107_v34 = vld [vmem:[%s1466_s7 + $0x8] ss:$16 sps:$4 sm:$0xff]   ;;  %v1114_v41 = vld [vmem:[%s1472_s23 + $0x60] sm:$0xff]  }
  0x5c   : > { %471 = vmatprep.subr.bf16.mxu0 %v1068_v8  ;;  %514 = vmatprep.subr.bf16.mxu1 %v1093_v20  ;;  %v1108_v35 = vld [vmem:[%s1472_s23 + $0x78] sm:$0xff]   ;;  %v1112_v39 = vld [vmem:[%s1472_s23 + $0x68] sm:$0xff]   ;;  %v1115_v42 = vld [vmem:[%s1472_s23 + $0x20] sm:$0xff]  }
  0x5d   : > { %v1109_v36 = vld [vmem:[%s1472_s23 + $0x38] sm:$0xff]   ;;  %v1113_v40 = vld [vmem:[%s1472_s23 + $0x28] sm:$0xff]   ;;  %v1118_v45 = vld [vmem:[%s1472_s23 + $0x50] sm:$0xff]  }
  0x5e   : > { %v1116_v43 = vld [vmem:[%s1472_s23 + $0x58] sm:$0xff]   ;;  %v1119_v46 = vld [vmem:[%s1472_s23 + $0x10] sm:$0xff]   ;;  %v1120_v47 = vld [vmem:[%s1472_s23 + $0x48] sm:$0xff]  }
  0x5f   : > { %472 = vmatpush1.bf16.msra.mxu0 %v1070_v9  ;;  %515 = vmatpush1.bf16.msra.mxu1 %v1095_v23  ;;  %v1117_v44 = vld [vmem:[%s1472_s23 + $0x18] sm:$0xff]   ;;  %v1121_v48 = vld [vmem:[%s1472_s23 + $0x8] sm:$0xff]   ;;  %v1122_v49 = vld [vmem:[%s1472_s23 + $0x40] sm:$0xff]  }
  0x60   : > { %473 = vmatprep.subr.bf16.mxu0 %v1071_v12  ;;  %516 = vmatprep.subr.bf16.mxu1 %v1096_v25  ;;  %v1123_v50 = vld [vmem:[%s1472_s23] sm:$0xff]  }
  0x63   : > { %474 = vmatpush1.bf16.msra.mxu0 %v1073_v15  ;;  %517 = vmatpush1.bf16.msra.mxu1 %v1098_v26 }
  0x64   : > { %475 = vmatprep.subr.bf16.mxu0 %v1074_v17  ;;  %518 = vmatprep.subr.bf16.mxu1 %v1099_v28 }
  0x67   : > { %476 = vmatpush1.bf16.msra.mxu0 %v1076_v19  ;;  %519 = vmatpush1.bf16.msra.mxu1 %v1101_v30 }
  0x68   : > { %477 = vmatprep.subr.bf16.mxu0 %v1077_v21  ;;  %520 = vmatprep.subr.bf16.mxu1 %v1102_v31 }
  0x6b   : > { %478 = vmatpush1.bf16.msra.mxu0 %v1079_v22  ;;  %521 = vmatpush1.bf16.msra.mxu1 %v1104_v32  ;;  %v583_v22 = vld [vmem:[#allocation2] sm:$0xff] }
  0x6c   : > { %479 = vmatprep.subr.bf16.mxu0 %v1080_v24  ;;  %522 = vmatprep.subr.bf16.mxu1 %v1105_v33 }
  0x6f   : > { %480 = vmatpush1.bf16.msra.mxu0 %v1084_v27  ;;  %523 = vmatpush1.bf16.msra.mxu1 %v1107_v34  ;;  %v584_v27 = vld [vmem:[#allocation2 + $0x8] sm:$0xff] }
  0x70   : > { %950 = vmatprep.subr.bf16.mxu0 %v1108_v35 }
  0x72   : > { %498 = vmatmul.mubr.bf16.vlgmr.msra.gmra.mxu0 %v1086_v29  ;;  %541 = vmatmul.mubr.bf16.vlgmr.msra.gmra.mxu1 %v1086_v29 }
  0x73   : > { %951 = vmatpush3.bf16.msra.mxu0 %v1109_v36 }
  0x74   : > { %952 = vmatprep.subr.bf16.mxu0 %v1110_v37 }
  0x77   : > { %953 = vmatpush3.bf16.msra.mxu0 %v1111_v38 }
  0x78   : > { %954 = vmatprep.subr.bf16.mxu0 %v1112_v39 }
  0x7b   : > { %955 = vmatpush3.bf16.msra.mxu0 %v1113_v40 }
  0x7c   : > { %956 = vmatprep.subr.bf16.mxu0 %v1114_v41 }
  0x7f   : > { %957 = vmatpush3.bf16.msra.mxu0 %v1115_v42 }
  0x80   : > { %958 = vmatprep.subr.bf16.mxu0 %v1116_v43 }
  0x83   : > { %959 = vmatpush3.bf16.msra.mxu0 %v1117_v44 }
  0x84   : > { %960 = vmatprep.subr.bf16.mxu0 %v1118_v45 }
  0x87   : > { %961 = vmatpush3.bf16.msra.mxu0 %v1119_v46 }
  0x88   : > { %962 = vmatprep.subr.bf16.mxu0 %v1120_v47 }
  0x8b   : > { %963 = vmatpush3.bf16.msra.mxu0 %v1121_v48 }
  0x8c   : > { %964 = vmatprep.subr.bf16.mxu0 %v1122_v49 }
  0x8f   : > { %965 = vmatpush3.bf16.msra.mxu0 %v1123_v50 }
 0x132   : > { %v499_v51 = vpop.f32.mrf.mxu0  ;;  %v542_v3 = vpop.f32.mrf.mxu1 }
 0x133   : > { %v923_v52 = vmul.f32 -1.442695, %v499_v51 }
 0x134   : > { %v501_v53 = vpop.f32.mrf.mxu0  ;;  %v544_v4 = vpop.f32.mrf.mxu1 }
 0x135   : > { %1124 = vpow2.f32 %v923_v52  ;;  %v924_v54 = vmul.f32 -1.442695, %v501_v53 }
 0x136   : > { %v503_v55 = vpop.f32.mrf.mxu0  ;;  %v546_v8 = vpop.f32.mrf.mxu1 }
 0x137   : > { %1126 = vpow2.f32 %v924_v54  ;;  %v925_v56 = vmul.f32 -1.442695, %v503_v55 }
 0x138   : > { %v505_v57 = vpop.f32.mrf.mxu0  ;;  %v548_v15 = vpop.f32.mrf.mxu1 }
 0x139   : > { %1128 = vpow2.f32 %v925_v56  ;;  %v926_v58 = vmul.f32 -1.442695, %v505_v57 }
 0x13b   : > { %1130 = vpow2.f32 %v926_v58 }
 0x142   : > { %v1125_v59 = vpop.eup %1124 }
 0x143   : > { %v563_v61 = vadd.f32 1.0, %v1125_v59 }
 0x144   : > { %v1127_v60 = vpop.eup %1126 }
 0x145   : > { %v564_v62 = vadd.f32 1.0, %v1127_v60 }
 0x146   : > { %v1129_v63 = vpop.eup %1128 }
 0x147   : > { %1132 = vrcp.f32 %v564_v62  ;;  %v565_v0 = vadd.f32 1.0, %v1129_v63 }
 0x148   : > { %v1131_v1 = vpop.eup %1130  ;;  %1134 = vrcp.f32 %v563_v61 }
 0x149   : > { %1136 = vrcp.f32 %v565_v0  ;;  %v566_v2 = vadd.f32 1.0, %v1131_v1 }
 0x14b   : > { %1138 = vrcp.f32 %v566_v2 }
 0x154   : > { %v1133_v5 = vpop.eup %1132 }
 0x155   : > { %v1135_v6 = vpop.eup %1134  ;;  %v576_v9 = vmul.f32 %v1133_v5, %v501_v53 }
 0x156   : > { %v1137_v7 = vpop.eup %1136  ;;  %v575_v12 = vmul.f32 %v1135_v6, %v499_v51 }
 0x157   : > { %v577_v10 = vmul.f32 %v1137_v7, %v503_v55  ;;  %v580_v16 = vmul.f32 %v576_v9, %v544_v4 }
 0x158   : > { %v1139_v11 = vpop.eup %1138  ;;  %v579_v18 = vmul.f32 %v575_v12, %v542_v3 }
 0x159   : > { %v578_v13 = vmul.f32 %v1139_v11, %v505_v57  ;;  %v581_v14 = vmul.f32 %v577_v10, %v546_v8 }
 0x15b   : > { %v582_v17 = vmul.f32 %v578_v13, %v548_v15  ;;  %v585_v20 = vpack.c.bf16 %v581_v14, %v579_v18 }
 0x15d   : > { %v586_v19 = vpack.c.bf16 %v582_v17, %v580_v16 }
 0x15f   : > { %747 = vmatprep.mubr.bf16.mxu0 %v586_v19 }
 0x160   : > { %748 = vmatmul.mubr.bf16.vlgmr.msra.gmra.mxu0 %v585_v20 }
 0x220   : > { %v966_v21 = vpop.f32.mrf.mxu0 }
 0x222   : > { %v967_v23 = vpop.f32.mrf.mxu0 }
 0x223   : > { %v968_v24 = vadd.f32 %v967_v23, %v966_v21 }
 0x224   : > { %v969_v25 = vpop.f32.mrf.mxu0 }
 0x225   : > { %v756_v26 = vadd.f32 %v968_v24, %v583_v22 }
 0x226   : > { %v970_v28 = vpop.f32.mrf.mxu0 }
 0x227   : > { %758 = vst [vmem:[#allocation2] sm:$0xff] %v756_v26  ;;  %v971_v29 = vadd.f32 %v970_v28, %v969_v25  ;;  %763 = sbr.rel (%p943_p7) target bundleno = 564 (0x234), region = 52 }
 0x229   : > { %v757_v30 = vadd.f32 %v971_v29, %v584_v27 }
 0x22b   : > { %759 = vst [vmem:[#allocation2 + $0x8] sm:$0xff] %v757_v30 }
 0x22e   : > { %v764_v31 = vld [vmem:[#allocation2] sm:$0xff] }
 0x22f   : > { %766 = vst [vmem:[#allocation9] sm:$0xff] %v764_v31 }
 0x232   : > { %v765_v32 = vld [vmem:[#allocation2 + $0x8] sm:$0xff] }
 0x233   : > { %767 = vst [vmem:[#allocation9 + $0x8] sm:$0xff] %v765_v32 }
 0x234 PF: > { %p998_p2 = scmp.eq.s32.totalorder %s1405_s20, 1  ;;  %s1316_s21 = smov [#allocation9]  }
 0x235   : > { %s777_s6 = sshll.u32 %s1316_s21, 4  ;;  %s778_s6 = int_to_ptr.vmem [resolvable:$true] %s777_s6 }
 0x236   : > { %s1222_s8 = scalar_lea.vmem %s778_s6, 256  ;;  %p1229_p9 = scmp.lt.s32.totalorder %s778_s6, %s778_s6 }
 0x237   : > { %p1223_p5 = scmp.ne.s32.totalorder %s778_s6, %s1222_s8  ;;  %p1230_p11 = scmp.lt.s32.totalorder %s1222_s8, %s1222_s8 }
 0x239   : > { %p1224_p8 = pnand %p1223_p5, %p998_p2  ;;  %p1231_p12 = por %p1230_p11, %p1229_p9 }
 0x23b   : > { %p1225_p10 = pneg %p1224_p8 }
 0x23d   : > { %p1232_p13 = pnand %p1231_p12, %p1225_p10 }
 0x23f   : > { %1235 = shalt.err (!%p1232_p13)
}
 0x240   : > { %s1317_s15 = smov 128   ;;  %s1318_s9 = smov 8  }
 0x241   : > { %981 = dma.vmem_to_hbm [thread:$0]  (%p998_p2), %s778_s6, 256, %s1557_s3, [#allocation5], %s1317_s15, %s1317_s15, %s1318_s9  }
 0x242   : > { %1279 = dma.done.wait (%p998_p2), [#allocation5], 256  }
 0x243   : > { %1281 = vsyncadd (%p998_p2), [#allocation5], 4294967040 }
 0x244 PF: > { %s18_s17 = sadd.s32 1, %s1304_s17   ;;  %s1562_s12 = smov %s1288_s13 }
 0x245   : > { %p15_p0 = scmp.ge.s32.totalorder %s18_s17, 4   ;;  %s1563_s13 = smov %s1292_s14 }
 0x246   : > { %s1564_s14 = smov %s1383_s24  ;;  %s1565_s15 = smov %s1300_s16 }
 0x247   : > { %s1566_s16 = smov %s1568_s18  ;;  %17 = sbr.rel (!%p15_p0) target bundleno = 6 (0x6), region = 95 }
 0x24c   :  { %793 = vsyncpa [#allocation4], 1 }
 0x24d   :  { %795 = vsyncpa [#allocation4 + $0x1], 1 }
 0x24e   :  { %796 = vsyncpa [#allocation7], 1 }
 0x24f   :  { %798 = vsyncpa [#allocation7 + $0x1], 1 }
 0x250   :  { %799 = vsyncpa [#allocation5], 1 }
 0x251   :  { %801 = vsyncpa [#allocation5 + $0x1], 1 }

</bundles_post_ra>
